<compile_context>
chip_gen: v5e
topology: v5e:2x2
jax: 0.10.0
libtpu: 0.0.40
codegen_flags: <defaults>
</compile_context>

<pallas_src>
import functools

import jax
import jax.numpy as jnp
from jax.experimental import pallas as pl
from jax.experimental.pallas import tpu as pltpu


def conv2d_kernel(w_ref, b_ref, x_ref, o_ref, *, OC, KH, KW, H, W):
    """Direct 3x3 valid conv, C_in = 1, on a lane-dense flattened image.

    w_ref : SMEM (OC*KH*KW,) f32  -- scalar tap weights (oc-major)
    b_ref : SMEM (OC,)       f32
    x_ref : VMEM (N, H*W)    f32  -- image rows flattened onto the lane axis
    o_ref : VMEM (N, OC, H*W) f32 -- full-plane output; the valid (Ho, Wo)
                                     window is sliced out by the wrapper
    """
    x = x_ref[...]                      # (N, H*W): 2 full 128-lane vregs / row
    HW = H * W

    # Hoist every scalar parameter read out of the unrolled tap loop.
    w = [[w_ref[oc * KH * KW + t] for t in range(KH * KW)] for oc in range(OC)]
    b = [b_ref[oc] for oc in range(OC)]

    accs = [jnp.zeros_like(x) for _ in range(OC)]
    for kh in range(KH):
        for kw in range(KW):
            t = kh * KW + kw
            d = kh * W + kw
            # shifted[n, p] == x[n, (p + d) mod HW].  The circular wrap only
            # affects flat positions whose (i, j) falls outside the valid
            # (Ho, Wo) window, and those are discarded by the wrapper slice.
            shifted = x if d == 0 else pltpu.roll(x, HW - d, axis=1)
            for oc in range(OC):        # reuse each shift for every out channel
                accs[oc] = accs[oc] + shifted * w[oc][t]

    for oc in range(OC):
        # Lane-dense, 256-lane aligned, unmasked store per output plane.
        o_ref[:, oc, :] = (accs[oc] + b[oc]).astype(o_ref.dtype)


def single_conv_forward(x_nchw, weight, bias):
    """x_nchw: (N, 1, H, W); weight: (OC, 1, KH, KW); bias: (OC,). Returns NCHW."""
    N, Cin, H, W = x_nchw.shape
    assert Cin == 1, "SingleConvModel has in_channels=1"
    OC, _, KH, KW = weight.shape
    Ho, Wo = H - KH + 1, W - KW + 1

    x = x_nchw.reshape(N, H * W).astype(jnp.float32)           # lane-dense image
    w_flat = weight.reshape(OC * KH * KW).astype(jnp.float32)  # 1-D SMEM weights
    b = bias.astype(jnp.float32)

    kernel = functools.partial(conv2d_kernel, OC=OC, KH=KH, KW=KW, H=H, W=W)
    out_full = pl.pallas_call(
        kernel,
        out_shape=jax.ShapeDtypeStruct((N, OC, H * W), jnp.float32),
        in_specs=[
            pl.BlockSpec(memory_space=pltpu.MemorySpace.SMEM),   # weights
            pl.BlockSpec(memory_space=pltpu.MemorySpace.SMEM),   # bias
            pl.BlockSpec(memory_space=pltpu.MemorySpace.VMEM),   # image
        ],
        out_specs=pl.BlockSpec(memory_space=pltpu.MemorySpace.VMEM),
    )(w_flat, b, x)

    # Free row-major reshape back to full NCHW planes, then slice the valid
    # (Ho, Wo) window outside the kernel.
    return out_full.reshape(N, OC, H, W)[:, :, :Ho, :Wo]


if __name__ == "__main__":
    key = jax.random.PRNGKey(0)
    k_x, k_w, k_b = jax.random.split(key, 3)

    # Small shapes consistent with the module: N=2, C_in=1, 16x16 spatial.
    x = jax.random.normal(k_x, (2, 1, 16, 16), dtype=jnp.float32)
    # Conv2d(1, 2, 3) parameter shapes: weight (2,1,3,3), bias (2,).
    fan_in = 1 * 3 * 3
    bound = 1.0 / (fan_in ** 0.5)
    weight = jax.random.uniform(k_w, (2, 1, 3, 3), jnp.float32, -bound, bound)
    bias = jax.random.uniform(k_b, (2,), jnp.float32, -bound, bound)

    forward = jax.jit(single_conv_forward)
    out = forward(x, weight, bias)
    out = jax.block_until_ready(out)

    # Reference check against lax conv (NCHW / OIHW, VALID padding).
    ref = jax.lax.conv_general_dilated(
        x, weight, window_strides=(1, 1), padding="VALID",
        dimension_numbers=("NCHW", "OIHW", "NCHW"),
    ) + bias.reshape(1, -1, 1, 1)
    assert out.shape == (2, 2, 14, 14), out.shape
    assert jnp.allclose(out, ref, atol=1e-5, rtol=1e-5), "mismatch vs lax reference"

    print("KERNEL_OK")
</pallas_src>

<mosaic_0001>
module attributes {stable_mosaic.version = 11 : i64} {
  func.func @conv2d_kernel(%arg0: memref<18xf32, #tpu.memory_space<smem>>, %arg1: memref<2xf32, #tpu.memory_space<smem>>, %arg2: memref<2x256xf32, #tpu.memory_space<vmem>>, %arg3: memref<2x2x256xf32, #tpu.memory_space<vmem>>) attributes {dimension_semantics = [], scalar_prefetch = 0 : i64, scratch_operands = 0 : i64, tpu.core_type = #tpu.core_type<tc>} {
    %c0 = arith.constant 0 : index
    %c0_0 = arith.constant 0 : index
    %0 = vector.load %arg2[%c0, %c0_0] : memref<2x256xf32, #tpu.memory_space<vmem>>, vector<2x256xf32>
    %c0_1 = arith.constant 0 : index
    %1 = memref.load %arg0[%c0_1] : memref<18xf32, #tpu.memory_space<smem>>
    %c1 = arith.constant 1 : index
    %2 = memref.load %arg0[%c1] : memref<18xf32, #tpu.memory_space<smem>>
    %c2 = arith.constant 2 : index
    %3 = memref.load %arg0[%c2] : memref<18xf32, #tpu.memory_space<smem>>
    %c3 = arith.constant 3 : index
    %4 = memref.load %arg0[%c3] : memref<18xf32, #tpu.memory_space<smem>>
    %c4 = arith.constant 4 : index
    %5 = memref.load %arg0[%c4] : memref<18xf32, #tpu.memory_space<smem>>
    %c5 = arith.constant 5 : index
    %6 = memref.load %arg0[%c5] : memref<18xf32, #tpu.memory_space<smem>>
    %c6 = arith.constant 6 : index
    %7 = memref.load %arg0[%c6] : memref<18xf32, #tpu.memory_space<smem>>
    %c7 = arith.constant 7 : index
    %8 = memref.load %arg0[%c7] : memref<18xf32, #tpu.memory_space<smem>>
    %c8 = arith.constant 8 : index
    %9 = memref.load %arg0[%c8] : memref<18xf32, #tpu.memory_space<smem>>
    %c9 = arith.constant 9 : index
    %10 = memref.load %arg0[%c9] : memref<18xf32, #tpu.memory_space<smem>>
    %c10 = arith.constant 10 : index
    %11 = memref.load %arg0[%c10] : memref<18xf32, #tpu.memory_space<smem>>
    %c11 = arith.constant 11 : index
    %12 = memref.load %arg0[%c11] : memref<18xf32, #tpu.memory_space<smem>>
    %c12 = arith.constant 12 : index
    %13 = memref.load %arg0[%c12] : memref<18xf32, #tpu.memory_space<smem>>
    %c13 = arith.constant 13 : index
    %14 = memref.load %arg0[%c13] : memref<18xf32, #tpu.memory_space<smem>>
    %c14 = arith.constant 14 : index
    %15 = memref.load %arg0[%c14] : memref<18xf32, #tpu.memory_space<smem>>
    %c15 = arith.constant 15 : index
    %16 = memref.load %arg0[%c15] : memref<18xf32, #tpu.memory_space<smem>>
    %c16 = arith.constant 16 : index
    %17 = memref.load %arg0[%c16] : memref<18xf32, #tpu.memory_space<smem>>
    %c17 = arith.constant 17 : index
    %18 = memref.load %arg0[%c17] : memref<18xf32, #tpu.memory_space<smem>>
    %c0_2 = arith.constant 0 : index
    %19 = memref.load %arg1[%c0_2] : memref<2xf32, #tpu.memory_space<smem>>
    %c1_3 = arith.constant 1 : index
    %20 = memref.load %arg1[%c1_3] : memref<2xf32, #tpu.memory_space<smem>>
    %cst = arith.constant 0.000000e+00 : f32
    %21 = vector.broadcast %cst : f32 to vector<2x256xf32>
    %cst_4 = arith.constant 0.000000e+00 : f32
    %22 = vector.broadcast %cst_4 : f32 to vector<2x256xf32>
    %23 = vector.broadcast %1 : f32 to vector<2x256xf32>
    %24 = arith.mulf %0, %23 : vector<2x256xf32>
    %25 = arith.addf %21, %24 : vector<2x256xf32>
    %26 = vector.broadcast %10 : f32 to vector<2x256xf32>
    %27 = arith.mulf %0, %26 : vector<2x256xf32>
    %28 = arith.addf %22, %27 : vector<2x256xf32>
    %c255_i32 = arith.constant 255 : i32
    %29 = tpu.dynamic_rotate %0 by %c255_i32 dim 1 : vector<2x256xf32>, i32 -> vector<2x256xf32>
    %30 = vector.broadcast %2 : f32 to vector<2x256xf32>
    %31 = arith.mulf %29, %30 : vector<2x256xf32>
    %32 = arith.addf %25, %31 : vector<2x256xf32>
    %33 = vector.broadcast %11 : f32 to vector<2x256xf32>
    %34 = arith.mulf %29, %33 : vector<2x256xf32>
    %35 = arith.addf %28, %34 : vector<2x256xf32>
    %c254_i32 = arith.constant 254 : i32
    %36 = tpu.dynamic_rotate %0 by %c254_i32 dim 1 : vector<2x256xf32>, i32 -> vector<2x256xf32>
    %37 = vector.broadcast %3 : f32 to vector<2x256xf32>
    %38 = arith.mulf %36, %37 : vector<2x256xf32>
    %39 = arith.addf %32, %38 : vector<2x256xf32>
    %40 = vector.broadcast %12 : f32 to vector<2x256xf32>
    %41 = arith.mulf %36, %40 : vector<2x256xf32>
    %42 = arith.addf %35, %41 : vector<2x256xf32>
    %c240_i32 = arith.constant 240 : i32
    %43 = tpu.dynamic_rotate %0 by %c240_i32 dim 1 : vector<2x256xf32>, i32 -> vector<2x256xf32>
    %44 = vector.broadcast %4 : f32 to vector<2x256xf32>
    %45 = arith.mulf %43, %44 : vector<2x256xf32>
    %46 = arith.addf %39, %45 : vector<2x256xf32>
    %47 = vector.broadcast %13 : f32 to vector<2x256xf32>
    %48 = arith.mulf %43, %47 : vector<2x256xf32>
    %49 = arith.addf %42, %48 : vector<2x256xf32>
    %c239_i32 = arith.constant 239 : i32
    %50 = tpu.dynamic_rotate %0 by %c239_i32 dim 1 : vector<2x256xf32>, i32 -> vector<2x256xf32>
    %51 = vector.broadcast %5 : f32 to vector<2x256xf32>
    %52 = arith.mulf %50, %51 : vector<2x256xf32>
    %53 = arith.addf %46, %52 : vector<2x256xf32>
    %54 = vector.broadcast %14 : f32 to vector<2x256xf32>
    %55 = arith.mulf %50, %54 : vector<2x256xf32>
    %56 = arith.addf %49, %55 : vector<2x256xf32>
    %c238_i32 = arith.constant 238 : i32
    %57 = tpu.dynamic_rotate %0 by %c238_i32 dim 1 : vector<2x256xf32>, i32 -> vector<2x256xf32>
    %58 = vector.broadcast %6 : f32 to vector<2x256xf32>
    %59 = arith.mulf %57, %58 : vector<2x256xf32>
    %60 = arith.addf %53, %59 : vector<2x256xf32>
    %61 = vector.broadcast %15 : f32 to vector<2x256xf32>
    %62 = arith.mulf %57, %61 : vector<2x256xf32>
    %63 = arith.addf %56, %62 : vector<2x256xf32>
    %c224_i32 = arith.constant 224 : i32
    %64 = tpu.dynamic_rotate %0 by %c224_i32 dim 1 : vector<2x256xf32>, i32 -> vector<2x256xf32>
    %65 = vector.broadcast %7 : f32 to vector<2x256xf32>
    %66 = arith.mulf %64, %65 : vector<2x256xf32>
    %67 = arith.addf %60, %66 : vector<2x256xf32>
    %68 = vector.broadcast %16 : f32 to vector<2x256xf32>
    %69 = arith.mulf %64, %68 : vector<2x256xf32>
    %70 = arith.addf %63, %69 : vector<2x256xf32>
    %c223_i32 = arith.constant 223 : i32
    %71 = tpu.dynamic_rotate %0 by %c223_i32 dim 1 : vector<2x256xf32>, i32 -> vector<2x256xf32>
    %72 = vector.broadcast %8 : f32 to vector<2x256xf32>
    %73 = arith.mulf %71, %72 : vector<2x256xf32>
    %74 = arith.addf %67, %73 : vector<2x256xf32>
    %75 = vector.broadcast %17 : f32 to vector<2x256xf32>
    %76 = arith.mulf %71, %75 : vector<2x256xf32>
    %77 = arith.addf %70, %76 : vector<2x256xf32>
    %c222_i32 = arith.constant 222 : i32
    %78 = tpu.dynamic_rotate %0 by %c222_i32 dim 1 : vector<2x256xf32>, i32 -> vector<2x256xf32>
    %79 = vector.broadcast %9 : f32 to vector<2x256xf32>
    %80 = arith.mulf %78, %79 : vector<2x256xf32>
    %81 = arith.addf %74, %80 : vector<2x256xf32>
    %82 = vector.broadcast %18 : f32 to vector<2x256xf32>
    %83 = arith.mulf %78, %82 : vector<2x256xf32>
    %84 = arith.addf %77, %83 : vector<2x256xf32>
    %85 = vector.broadcast %19 : f32 to vector<2x256xf32>
    %86 = arith.addf %81, %85 : vector<2x256xf32>
    %c0_5 = arith.constant 0 : index
    %c0_6 = arith.constant 0 : index
    %c0_7 = arith.constant 0 : index
    %87 = vector.load %arg3[%c0_5, %c0_6, %c0_7] : memref<2x2x256xf32, #tpu.memory_space<vmem>>, vector<2x1x256xf32>
    %88 = vector.shape_cast %87 : vector<2x1x256xf32> to vector<2x256xf32>
    %89 = vector.shape_cast %86 : vector<2x256xf32> to vector<2x1x256xf32>
    tpu.vector_store %arg3[%c0_5, %c0_6, %c0_7], %89 {strides = array<i32>} : memref<2x2x256xf32, #tpu.memory_space<vmem>>, vector<2x1x256xf32>,
    %90 = vector.broadcast %20 : f32 to vector<2x256xf32>
    %91 = arith.addf %84, %90 : vector<2x256xf32>
    %c0_8 = arith.constant 0 : index
    %c1_9 = arith.constant 1 : index
    %c0_10 = arith.constant 0 : index
    %92 = vector.load %arg3[%c0_8, %c1_9, %c0_10] : memref<2x2x256xf32, #tpu.memory_space<vmem>>, vector<2x1x256xf32>
    %93 = vector.shape_cast %92 : vector<2x1x256xf32> to vector<2x256xf32>
    %94 = vector.shape_cast %91 : vector<2x256xf32> to vector<2x1x256xf32>
    tpu.vector_store %arg3[%c0_8, %c1_9, %c0_10], %94 {strides = array<i32>} : memref<2x2x256xf32, #tpu.memory_space<vmem>>, vector<2x1x256xf32>,
    return
  }
}

</mosaic_0001>

<bundles_post_ra>
// kernel: single_conv_forward.1
= control target key start
LH: loop header
LB: loop body
LE: loop exit
PB: predicated region body
PF: predicated region fallthrough
CT: control target
= control target key end

     0   :  { %8 = vsyncpa [#allocation3], 0  ;;  %s632_s0 = inlined_call_operand.vmem [shape: f32[18], index: 0, kind: input, shape index: {}]   ;;  %s633_s1 = inlined_call_operand.vmem [shape: f32[2], index: 1, kind: input, shape index: {}]   ;;  %s634_s2 = inlined_call_operand.vmem [shape: f32[2,256], index: 2, kind: input, shape index: {}]   ;;  %s635_s3 = inlined_call_operand.vmem [shape: f32[2,2,256], index: 3, kind: output, shape index: {}]  }
   0x1   :  { %s15_s14 = sshll.u32 %s632_s0, 4  ;;  %s16_s14 = int_to_ptr.vmem [resolvable:$true] %s15_s14 }
   0x2   :  { %9 = vsyncpa [#allocation5], 0  ;;  %s24_s17 = sshll.u32 %s633_s1, 4  ;;  %s421_s18 = smov [#allocation2]   ;;  %s25_s17 = int_to_ptr.vmem [resolvable:$true] %s24_s17 }
   0x3   :  { %18 = dma.vmem_to_smem %s16_s14, 16, %s421_s18, [#allocation3]  }
   0x4   :  { %s422_s19 = smov [#allocation4]  }
   0x5   :  { %27 = dma.vmem_to_smem %s25_s17, 16, %s422_s19, [#allocation5]  }
   0x6   :  { %417 = dma.done.wait [#allocation3], 16  }
   0x7   :  { %418 = vsyncadd [#allocation3], 4294967280 }
   0x8   :  { %419 = dma.done.wait [#allocation5], 16  }
   0x9   :  { %420 = vsyncadd [#allocation5], 4294967280 }
   0xa   :  { %38 = sfence }
   0xb   :  { %v460_v0 = vld [vmem:[%s634_s2] sm:$0xf]  ;;  %s423_s0 = smov 127   ;;  %s424_s1 = smov 126   ;;  %v76_v20 = vlaneseq  ;;  %vm87_vm3 = vcmask 1041408   ;;  %vm316_vm9 = vcmask 1040384  }
   0xc   :  { %67 = vst [vmem:[#allocation1] ss:$4 sm:$0xff] %v460_v0  ;;  %s425_s2 = smov 112   ;;  %s426_s22 = smov 111   ;;  %vm318_vm10 = vcmask 1042434   ;;  %vm321_vm11 = vcmask 1041409  }
   0xd   :  { %s427_s23 = smov 110   ;;  %s428_s24 = smov 96   ;;  %v479_v21 = vand.u32 127, %v76_v20  ;;  %vm323_vm12 = vcmask 1043459   ;;  %vm325_vm13 = vcmask 1042433   ;;  %vm596_vm14 = vcmp.lt.s32.totalorder %v76_v20, 256 }
   0xe   :  { %s429_s25 = smov 95   ;;  %s430_s26 = smov 94  }
   0xf   :  { %s470_s27 = sld [smem:[#allocation2]]  ;;  %vm78_vm0 = vcmp.lt.s32.totalorder %v479_v21, 127  ;;  %vm139_vm1 = vcmp.lt.s32.totalorder %v479_v21, 112  ;;  %vm109_vm2 = vcmp.lt.s32.totalorder %v479_v21, 126  ;;  %vm169_vm4 = vcmp.lt.s32.totalorder %v479_v21, 111 }
  0x10   :  { %s472_s28 = sld [smem:[#allocation2 + $0x1]]  ;;  %vm199_vm5 = vcmp.lt.s32.totalorder %v479_v21, 110  ;;  %vm229_vm6 = vcmp.lt.s32.totalorder %v479_v21, 96  ;;  %vm259_vm7 = vcmp.lt.s32.totalorder %v479_v21, 95  ;;  %vm289_vm8 = vcmp.lt.s32.totalorder %v479_v21, 94 }
  0x11   :  { %s474_s29 = sld [smem:[#allocation2 + $0x9]] }
  0x12   :  { %s476_s30 = sld [smem:[#allocation2 + $0xa]] }
  0x13   :  { %v68_v1 = vld.sshfl [vmem:[#allocation1] sm:$0xff pattern:$0x73625140]  ;;  %v69_v2 = vld.sshfl [vmem:[#allocation1 + $0x8] sm:$0xff pattern:$0x73625140] }
  0x14   :  { %72 = vrot.lane.b32.xlu0 %v68_v1, %s423_s0  ;;  %100 = vst [vmem:[#allocation1] ss:$4 sm:$0xff] %v460_v0  ;;  %s481_s4 = sld [smem:[#allocation2 + $0x3]] }
  0x15   :  { %s483_s5 = sld [smem:[#allocation2 + $0xc]]  ;;  %v60_v32 = vstv %s470_s27 }
  0x16   :  { %s485_s6 = sld [smem:[#allocation2 + $0x2]]  ;;  %v81_v25 = vstv %s472_s28  ;;  %v61_v45 = vmul.f32 %v60_v32, %v460_v0 }
  0x17   :  { %s487_s7 = sld [smem:[#allocation2 + $0xb]]  ;;  %v63_v33 = vstv %s474_s29 }
  0x18   :  { %v91_v26 = vstv %s476_s30  ;;  %s495_s8 = sld [smem:[#allocation2 + $0x4]]  ;;  %v64_v46 = vmul.f32 %v63_v33, %v460_v0 }
  0x19   :  { %s497_s9 = sld [smem:[#allocation2 + $0xd]] }
  0x1a   :  { %v142_v29 = vstv %s481_s4  ;;  %s506_s10 = sld [smem:[#allocation2 + $0x5]] }
  0x1b   :  { %v101_v3 = vld.sshfl [vmem:[#allocation1] sm:$0xff pattern:$0x73625140]  ;;  %v102_v4 = vld.sshfl [vmem:[#allocation1 + $0x8] sm:$0xff pattern:$0x73625140]  ;;  %v151_v30 = vstv %s483_s5 }
  0x1c   :  { %105 = vrot.lane.b32.xlu1 %v101_v3, %s424_s1  ;;  %74 = vrot.lane.b32.xlu0 %v69_v2, %s423_s0  ;;  %130 = vst [vmem:[#allocation1] ss:$4 sm:$0xff] %v460_v0  ;;  %s510_s11 = sld [smem:[#allocation2 + $0xe]]  ;;  %v112_v39 = vstv %s485_s6 }
  0x1d   :  { %v121_v40 = vstv %s487_s7  ;;  %s520_s12 = sld [smem:[#allocation2 + $0x6]] }
  0x1e   :  { %s524_s13 = sld [smem:[#allocation2 + $0xf]]  ;;  %v172_v58 = vstv %s495_s8 }
  0x1f   :  { %s527_s14 = sld [smem:[#allocation2 + $0x7]]  ;;  %v181_v59 = vstv %s497_s9 }
  0x20   :  { %s531_s15 = sld [smem:[#allocation2 + $0x10]]  ;;  %v202_v60 = vstv %s506_s10 }
  0x21   :  { %s562_s16 = sld [smem:[#allocation2 + $0x8]] }
  0x22   :  { %v211_v1 = vstv %s510_s11  ;;  %s564_s17 = sld [smem:[#allocation2 + $0x11]] }
  0x23   :  { %v131_v5 = vld.sshfl [vmem:[#allocation1] sm:$0xff pattern:$0x73625140]  ;;  %v132_v6 = vld.sshfl [vmem:[#allocation1 + $0x8] sm:$0xff pattern:$0x73625140] }
  0x24   :  { %107 = vrot.lane.b32.xlu1 %v102_v4, %s424_s1  ;;  %160 = vst [vmem:[#allocation1] ss:$4 sm:$0xff] %v460_v0  ;;  %135 = vrot.lane.b32.xlu2 %v131_v5, %s425_s2  ;;  %s574_s18 = sld [smem:[#allocation4]] }
  0x25   :  { %s579_s19 = sld [smem:[#allocation4 + $0x1]] }
  0x2b   :  { %v162_v7 = vld.sshfl [vmem:[#allocation1 + $0x8] sm:$0xff pattern:$0x73625140]  ;;  %v161_v8 = vld.sshfl [vmem:[#allocation1] sm:$0xff pattern:$0x73625140] }
  0x2c   :  { %167 = vrot.lane.b32.xlu1 %v162_v7, %s426_s22  ;;  %165 = vrot.lane.b32.xlu0 %v161_v8, %s426_s22  ;;  %190 = vst [vmem:[#allocation1] ss:$4 sm:$0xff] %v460_v0 }
  0x2d   :  { %137 = vrot.lane.b32.xlu2 %v132_v6, %s425_s2 }
  0x33   :  { %v191_v9 = vld.sshfl [vmem:[#allocation1] sm:$0xff pattern:$0x73625140]  ;;  %v192_v10 = vld.sshfl [vmem:[#allocation1 + $0x8] sm:$0xff pattern:$0x73625140] }
  0x34   :  { %197 = vrot.lane.b32.xlu0 %v192_v10, %s427_s23  ;;  %220 = vst [vmem:[#allocation1] ss:$4 sm:$0xff] %v460_v0  ;;  %v232_v10 = vstv %s520_s12 }
  0x35   :  { %195 = vrot.lane.b32.xlu2 %v191_v9, %s427_s23 }
  0x3b   :  { %v221_v11 = vld.sshfl [vmem:[#allocation1] sm:$0xff pattern:$0x73625140]  ;;  %v222_v12 = vld.sshfl [vmem:[#allocation1 + $0x8] sm:$0xff pattern:$0x73625140] }
  0x3c   :  { %225 = vrot.lane.b32.xlu1 %v221_v11, %s428_s24  ;;  %250 = vst [vmem:[#allocation1] ss:$4 sm:$0xff] %v460_v0 }
  0x3d   :  { %227 = vrot.lane.b32.xlu2 %v222_v12, %s428_s24 }
  0x43   :  { %v252_v13 = vld.sshfl [vmem:[#allocation1 + $0x8] sm:$0xff pattern:$0x73625140]  ;;  %v251_v14 = vld.sshfl [vmem:[#allocation1] sm:$0xff pattern:$0x73625140] }
  0x44   :  { %257 = vrot.lane.b32.xlu1 %v252_v13, %s429_s25  ;;  %255 = vrot.lane.b32.xlu0 %v251_v14, %s429_s25  ;;  %280 = vst [vmem:[#allocation1] ss:$4 sm:$0xff] %v460_v0  ;;  %v241_v14 = vstv %s524_s13 }
  0x4b   :  { %v282_v15 = vld.sshfl [vmem:[#allocation1 + $0x8] sm:$0xff pattern:$0x73625140]  ;;  %v281_v16 = vld.sshfl [vmem:[#allocation1] sm:$0xff pattern:$0x73625140] }
  0x4c   :  { %287 = vrot.lane.b32.xlu0 %v282_v15, %s430_s26  ;;  %285 = vrot.lane.b32.xlu2 %v281_v16, %s430_s26 }
  0x7e   :  { %v136_v19 = vpop.permute.xlu2 %135 }
  0x86   :  { %v73_v17 = vpop.permute.xlu0 %72 }
  0x87   :  { %v138_v24 = vpop.permute.xlu2 %137 }
  0x88   :  { %v141_v31 = vsel %vm139_vm1, %v138_v24, %v136_v19  ;;  %v140_v42 = vsel %vm139_vm1, %v136_v19, %v138_v24 }
  0x89   :  { %v144_v43 = vmul.f32 %v142_v29, %v141_v31  ;;  %v153_v44 = vmul.f32 %v151_v30, %v141_v31  ;;  %v143_v53 = vmul.f32 %v142_v29, %v140_v42  ;;  %v152_v56 = vmul.f32 %v151_v30, %v140_v42 }
  0x8b   :  { %v147_v55 = vrot.slane %v144_v43, 6  ;;  %v156_v57 = vrot.slane %v153_v44, 6 }
  0x8d   :  { %v148_v7 = vsel %vm87_vm3, %v143_v53, %v147_v55  ;;  %v157_v8 = vsel %vm87_vm3, %v152_v56, %v156_v57 }
  0x8e   :  { %v106_v18 = vpop.permute.xlu1 %105  ;;  %v75_v22 = vpop.permute.xlu0 %74 }
  0x8f   :  { %v80_v27 = vsel %vm78_vm0, %v75_v22, %v73_v17  ;;  %v196_v37 = vpop.permute.xlu2 %195  ;;  %v79_v38 = vsel %vm78_vm0, %v73_v17, %v75_v22 }
  0x90   :  { %v83_v34 = vmul.f32 %v81_v25, %v80_v27  ;;  %v93_v35 = vmul.f32 %v91_v26, %v80_v27  ;;  %v82_v47 = vmul.f32 %v81_v25, %v79_v38  ;;  %v92_v49 = vmul.f32 %v91_v26, %v79_v38 }
  0x91   :  { %v271_v27 = vstv %s531_s15 }
  0x92   :  { %v86_v48 = vrot.slane %v83_v34, 6  ;;  %v96_v50 = vrot.slane %v93_v35, 6 }
  0x94   :  { %v88_v61 = vsel %vm87_vm3, %v82_v47, %v86_v48  ;;  %v97_v62 = vsel %vm87_vm3, %v92_v49, %v96_v50 }
  0x95   :  { %v90_v15 = vadd.f32 %v88_v61, %v61_v45  ;;  %v99_v16 = vadd.f32 %v97_v62, %v64_v46  ;;  %v292_v62 = vstv %s562_s16 }
  0x96   :  { %v108_v23 = vpop.permute.xlu1 %107 }
  0x97   :  { %v111_v41 = vsel %vm109_vm2, %v108_v23, %v106_v18  ;;  %v110_v54 = vsel %vm109_vm2, %v106_v18, %v108_v23  ;;  %v228_v9 = vpop.permute.xlu2 %227  ;;  %v262_v23 = vstv %s527_s14 }
  0x98   :  { %v114_v51 = vmul.f32 %v112_v39, %v111_v41  ;;  %v123_v52 = vmul.f32 %v121_v40, %v111_v41  ;;  %v113_v3 = vmul.f32 %v112_v39, %v110_v54  ;;  %v122_v5 = vmul.f32 %v121_v40, %v110_v54 }
  0x9a   :  { %v117_v4 = vrot.slane %v114_v51, 6  ;;  %v126_v6 = vrot.slane %v123_v52, 6 }
  0x9c   :  { %v118_v18 = vsel %vm87_vm3, %v113_v3, %v117_v4  ;;  %v127_v19 = vsel %vm87_vm3, %v122_v5, %v126_v6 }
  0x9d   :  { %v120_v32 = vadd.f32 %v118_v18, %v90_v15  ;;  %v129_v33 = vadd.f32 %v127_v19, %v99_v16 }
  0x9e   :  { %v499_v28 = vpop.permute.xlu0 %165  ;;  %v168_v36 = vpop.permute.xlu1 %167 }
  0x9f   :  { %v171_v63 = vsel %vm169_vm4, %v168_v36, %v499_v28  ;;  %v170_v17 = vsel %vm169_vm4, %v499_v28, %v168_v36  ;;  %v150_v52 = vadd.f32 %v148_v7, %v120_v32  ;;  %v159_v53 = vadd.f32 %v157_v8, %v129_v33 }
  0xa0   :  { %v174_v11 = vmul.f32 %v172_v58, %v171_v63  ;;  %v183_v12 = vmul.f32 %v181_v59, %v171_v63  ;;  %v173_v29 = vmul.f32 %v172_v58, %v170_v17  ;;  %v182_v30 = vmul.f32 %v181_v59, %v170_v17 }
  0xa1   :  { %v301_v63 = vstv %s564_s17 }
  0xa2   :  { %v177_v28 = vrot.slane %v174_v11, 6  ;;  %v186_v31 = vrot.slane %v183_v12, 6 }
  0xa4   :  { %v178_v46 = vsel %vm87_vm3, %v173_v29, %v177_v28  ;;  %v187_v47 = vsel %vm87_vm3, %v182_v30, %v186_v31 }
  0xa5   :  { %v189_v61 = vadd.f32 %v187_v47, %v159_v53 }
  0xa6   :  { %v198_v0 = vpop.permute.xlu0 %197  ;;  %v286_v59 = vpop.permute.xlu2 %285 }
  0xa7   :  { %v201_v13 = vsel %vm199_vm5, %v198_v0, %v196_v37  ;;  %v200_v24 = vsel %vm199_vm5, %v196_v37, %v198_v0 }
  0xa8   :  { %v204_v25 = vmul.f32 %v202_v60, %v201_v13  ;;  %v213_v26 = vmul.f32 %v211_v1, %v201_v13  ;;  %v203_v39 = vmul.f32 %v202_v60, %v200_v24  ;;  %v212_v40 = vmul.f32 %v211_v1, %v200_v24 }
  0xa9   :  { %v180_v60 = vadd.f32 %v178_v46, %v150_v52  ;;  %v337_v24 = vstv %s579_s19 }
  0xaa   :  { %v207_v42 = vrot.slane %v204_v25, 6  ;;  %v216_v43 = vrot.slane %v213_v26, 6 }
  0xac   :  { %v208_v55 = vsel %vm87_vm3, %v203_v39, %v207_v42  ;;  %v217_v56 = vsel %vm87_vm3, %v212_v40, %v216_v43 }
  0xad   :  { %v210_v5 = vadd.f32 %v208_v55, %v180_v60  ;;  %v219_v6 = vadd.f32 %v217_v56, %v189_v61 }
  0xae   :  { %v226_v2 = vpop.permute.xlu1 %225 }
  0xaf   :  { %v231_v22 = vsel %vm229_vm6, %v228_v9, %v226_v2  ;;  %v230_v37 = vsel %vm229_vm6, %v226_v2, %v228_v9 }
  0xb0   :  { %v234_v34 = vmul.f32 %v232_v10, %v231_v22  ;;  %v243_v35 = vmul.f32 %v241_v14, %v231_v22  ;;  %v233_v48 = vmul.f32 %v232_v10, %v230_v37  ;;  %v242_v50 = vmul.f32 %v241_v14, %v230_v37 }
  0xb2   :  { %v237_v49 = vrot.slane %v234_v34, 6  ;;  %v246_v51 = vrot.slane %v243_v35, 6 }
  0xb4   :  { %v238_v0 = vsel %vm87_vm3, %v233_v48, %v237_v49  ;;  %v247_v1 = vsel %vm87_vm3, %v242_v50, %v246_v51 }
  0xb5   :  { %v240_v13 = vadd.f32 %v238_v0, %v210_v5  ;;  %v249_v14 = vadd.f32 %v247_v1, %v219_v6 }
  0xb6   :  { %v258_v36 = vpop.permute.xlu1 %257  ;;  %v256_v38 = vpop.permute.xlu0 %255 }
  0xb7   :  { %v261_v41 = vsel %vm259_vm7, %v258_v36, %v256_v38  ;;  %v260_v54 = vsel %vm259_vm7, %v256_v38, %v258_v36 }
  0xb8   :  { %v264_v44 = vmul.f32 %v262_v23, %v261_v41  ;;  %v273_v45 = vmul.f32 %v271_v27, %v261_v41  ;;  %v263_v2 = vmul.f32 %v262_v23, %v260_v54  ;;  %v272_v3 = vmul.f32 %v271_v27, %v260_v54 }
  0xb9   :  { %v310_v23 = vstv %s574_s18 }
  0xba   :  { %v267_v57 = vrot.slane %v264_v44, 6  ;;  %v276_v58 = vrot.slane %v273_v45, 6 }
  0xbc   :  { %v268_v9 = vsel %vm87_vm3, %v263_v2, %v267_v57  ;;  %v277_v10 = vsel %vm87_vm3, %v272_v3, %v276_v58 }
  0xbd   :  { %v270_v19 = vadd.f32 %v268_v9, %v240_v13  ;;  %v279_v22 = vadd.f32 %v277_v10, %v249_v14 }
  0xbe   :  { %v288_v4 = vpop.permute.xlu0 %287 }
  0xbf   :  { %v290_v7 = vsel %vm289_vm8, %v286_v59, %v288_v4  ;;  %v291_v8 = vsel %vm289_vm8, %v288_v4, %v286_v59 }
  0xc0   :  { %v294_v11 = vmul.f32 %v292_v62, %v291_v8  ;;  %v303_v12 = vmul.f32 %v301_v63, %v291_v8  ;;  %v293_v15 = vmul.f32 %v292_v62, %v290_v7  ;;  %v302_v17 = vmul.f32 %v301_v63, %v290_v7 }
  0xc2   :  { %v297_v16 = vrot.slane %v294_v11, 6  ;;  %v306_v18 = vrot.slane %v303_v12, 6 }
  0xc4   :  { %v298_v25 = vsel %vm87_vm3, %v293_v15, %v297_v16  ;;  %v307_v21 = vsel %vm87_vm3, %v302_v17, %v306_v18 }
  0xc5   :  { %v300_v26 = vadd.f32 %v298_v25, %v270_v19  ;;  %v309_v27 = vadd.f32 %v307_v21, %v279_v22 }
  0xc7   :  { %v311_v29 = vadd.f32 %v310_v23, %v300_v26  ;;  %v338_v28 = vadd.f32 %v337_v24, %v309_v27 }
  0xc9   :  { %v313_v30 = vrot.slane %v311_v29, 1  ;;  %v314_v31 = vrot.slane %v311_v29, 2  ;;  %v315_v32 = vrot.slane %v311_v29, 3  ;;  %v340_v33 = vrot.slane %v338_v28, 1 }
  0xca   :  { %v341_v35 = vrot.slane %v338_v28, 2  ;;  %v342_v36 = vrot.slane %v338_v28, 3 }
  0xcb   :  { %v317_v38 = vsel %vm316_vm9, %v311_v29, %v313_v30  ;;  %v319_v39 = vsel %vm318_vm10, %v314_v31, %v315_v32  ;;  %v322_v40 = vsel %vm321_vm11, %v311_v29, %v313_v30  ;;  %v324_v37 = vsel %vm323_vm12, %v314_v31, %v315_v32 }
  0xcc   :  { %v320_v41 = vsel %vm87_vm3, %v317_v38, %v319_v39  ;;  %v326_v42 = vsel %vm325_vm13, %v322_v40, %v324_v37  ;;  %v343_v43 = vsel %vm316_vm9, %v338_v28, %v340_v33  ;;  %v344_v20 = vsel %vm318_vm10, %v341_v35, %v342_v36 }
  0xcd   :  { %v327_v44 = vrot.slane %v326_v42, 1  ;;  %334 = vst.msk [vmem:[%s635_s3] ss:$2 sm:$0x3] %vm596_vm14, %v320_v41  ;;  %v345_v45 = vsel %vm87_vm3, %v343_v43, %v344_v20  ;;  %v346_v46 = vsel %vm321_vm11, %v338_v28, %v340_v33  ;;  %v347_v47 = vsel %vm323_vm12, %v341_v35, %v342_v36 }
  0xce   :  { %v348_v48 = vsel %vm325_vm13, %v346_v46, %v347_v47  ;;  %381 = vst.msk [vmem:[%s635_s3 + $0x1] ss:$2 sm:$0x3] %vm596_vm14, %v345_v45 }
  0xcf   :  { %380 = vst.msk [vmem:[%s635_s3 + $0x4] ss:$2 sm:$0x3] %vm596_vm14, %v327_v44  ;;  %v349_v49 = vrot.slane %v348_v48, 1 }
  0xd1   :  { %382 = vst.msk [vmem:[%s635_s3 + $0x5] ss:$2 sm:$0x3] %vm596_vm14, %v349_v49 }
  0xd2   :  { %360 = vsyncpa [#allocation3], 1 }
  0xd3   :  { %361 = vsyncpa [#allocation5], 1 }

</bundles_post_ra>
